<compile_context>
chip_gen: v5e
topology: v5e:2x2
jax: 0.10.0
libtpu: 0.0.40
codegen_flags: <defaults>
</compile_context>

<pallas_src>
import functools

import jax
import jax.numpy as jnp
from jax import lax
from jax.experimental import pallas as pl
from jax.experimental.pallas import tpu as pltpu


def _node_ext_kernel(nst_ref,                        # SMEM (T,) int32: #Euler steps per interval
                     y_ref, m_ref,                   # VMEM (T,B,D) zero-padded obs, (T,B,1) mask
                     w1_ref, b1_ref, w2_ref, b2_ref, w3_ref, b3_ref,
                     hcn_ref, hfin_ref,              # outputs: (T,B,D), (B,D)
                     *, input_dim):
    T = nst_ref.shape[0]
    B, D = hfin_ref.shape

    # Weights stay resident for the whole kernel (single invocation).
    w1 = w1_ref[...]
    b1 = b1_ref[...]
    w2 = w2_ref[...]
    b2 = b2_ref[...]
    w3 = w3_ref[...]                                 # already scaled by delta_t
    b3 = b3_ref[...]                                 # already scaled by delta_t

    # 1.0 on the observed columns (cols < input_dim), 0.0 on the latent columns.
    col_is_obs = (lax.broadcasted_iota(jnp.int32, (B, D), 1) < input_dim).astype(jnp.float32)

    def euler_step(_, h):
        # One Euler step:  h <- h + delta_t * node(h)   (delta_t folded into w3/b3).
        # bf16 operands on the MXU, f32 accumulation, f32 carried state.
        z1 = jnp.maximum(
            jnp.dot(h.astype(w1.dtype), w1, preferred_element_type=jnp.float32) + b1, 0.0)
        z2 = jnp.maximum(
            jnp.dot(z1.astype(w2.dtype), w2, preferred_element_type=jnp.float32) + b2, 0.0)
        return h + jnp.dot(z2.astype(w3.dtype), w3, preferred_element_type=jnp.float32) + b3

    def obs_body(i, h):
        # Integrate dh/dt = node(h) across interval i (n_i Euler steps, n_i from SMEM).
        h_cn = lax.fori_loop(0, nst_ref[i], euler_step, h)

        # ODE state at the observation time, before the measurement update.
        hcn_ref[i] = h_cn

        # Measurement update:
        #   h = cat(Y_i, h_cn[:, input_dim:]) * m_i + h_cn * (1 - m_i)
        #     = Y_i * (col_is_obs * m_i) + h_cn * (1 - col_is_obs * m_i)
        obs_m = col_is_obs * m_ref[i]                # (B, D)
        return y_ref[i] * obs_m + h_cn * (1.0 - obs_m)

    h0 = jnp.zeros((B, D), jnp.float32)
    h_final = lax.fori_loop(0, T, obs_body, h0)
    hfin_ref[...] = h_final


def node_ext_forward(times, Y, mask, params, *, Nc, input_dim, delta_t,
                     matmul_dtype=jnp.bfloat16):
    """times: (T,), Y: (B, T, input_dim), mask: (B, T).  Returns the 6-tuple of forward()."""
    B, T, _ = Y.shape
    D = 2 * Nc + input_dim
    H = params["w1"].shape[1]

    # --- glue: layout to (T, B, F), zero-pad observations to state width D ---
    y_tbf = jnp.transpose(Y, (1, 0, 2)).astype(jnp.float32)                 # (T,B,input_dim)
    y_pad = jnp.pad(y_tbf, ((0, 0), (0, 0), (0, D - input_dim)))            # (T,B,D)
    m_tb1 = jnp.transpose(mask, (1, 0)).astype(jnp.float32)[..., None]      # (T,B,1)

    # Per-interval Euler step counts (assumes intervals are multiples of delta_t).
    t_prev = jnp.concatenate([jnp.zeros((1,), times.dtype), times[:-1]])
    n_steps = jnp.round((times - t_prev) / delta_t).astype(jnp.int32)       # (T,)

    # Fold delta_t into the last layer; bf16 weights, f32 biases.
    dt = jnp.float32(delta_t)
    w1 = params["w1"].astype(matmul_dtype)
    w2 = params["w2"].astype(matmul_dtype)
    w3 = (params["w3"].astype(jnp.float32) * dt).astype(matmul_dtype)
    b1 = params["b1"].astype(jnp.float32)
    b2 = params["b2"].astype(jnp.float32)
    b3 = params["b3"].astype(jnp.float32) * dt

    kernel = functools.partial(_node_ext_kernel, input_dim=input_dim)

    grid_spec = pltpu.PrefetchScalarGridSpec(
        num_scalar_prefetch=1,          # n_steps -> SMEM
        grid=(1,),                      # single invocation: whole problem in one kernel body
        in_specs=[
            pl.BlockSpec((T, B, D), lambda i, n: (0, 0, 0)),   # Y (padded)
            pl.BlockSpec((T, B, 1), lambda i, n: (0, 0, 0)),   # mask
            pl.BlockSpec((D, H), lambda i, n: (0, 0)),         # W1
            pl.BlockSpec((1, H), lambda i, n: (0, 0)),         # b1
            pl.BlockSpec((H, H), lambda i, n: (0, 0)),         # W2
            pl.BlockSpec((1, H), lambda i, n: (0, 0)),         # b2
            pl.BlockSpec((H, D), lambda i, n: (0, 0)),         # W3 (* delta_t)
            pl.BlockSpec((1, D), lambda i, n: (0, 0)),         # b3 (* delta_t)
        ],
        out_specs=(
            pl.BlockSpec((T, B, D), lambda i, n: (0, 0, 0)),   # h_cn trajectory
            pl.BlockSpec((B, D), lambda i, n: (0, 0)),         # final updated h
        ),
    )

    h_cn_traj, h_final = pl.pallas_call(
        kernel,
        grid_spec=grid_spec,
        out_shape=(
            jax.ShapeDtypeStruct((T, B, D), jnp.float32),
            jax.ShapeDtypeStruct((B, D), jnp.float32),
        ),
        compiler_params=pltpu.CompilerParams(dimension_semantics=("arbitrary",)),
    )(n_steps, y_pad, m_tb1, w1, b1, w2, b2, w3, b3)

    # --- glue: assemble the module's return values ---
    y_preds = jnp.transpose(h_cn_traj[:, :, :input_dim], (1, 0, 2))   # (B, T, input_dim)
    # non-eval mode: eval_times = [t_prev, t_i] -> pred[1:] is exactly the endpoint pred
    y_traj = y_preds                                                  # (B, T, input_dim)
    times_traj = times                                                # (T,)
    h_cn = h_cn_traj[-1]                                              # (B, D)
    reverted_pred = None                                              # auto_encoder=False
    return y_preds, y_traj, times_traj, h_final, h_cn, reverted_pred


if __name__ == "__main__":
    key = jax.random.PRNGKey(0)
    keys = jax.random.split(key, 8)

    # Small shapes consistent with the module.
    B, T = 2, 8
    Nc, input_dim, hidden_dim = 4, 3, 32
    delta_t = 0.25
    D = 2 * Nc + input_dim

    def lin_init(kw, kb, fan_in, fan_out):
        # Deterministic init mimicking nn.Linear default (uniform +-1/sqrt(fan_in)).
        bound = 1.0 / (fan_in ** 0.5)
        w = jax.random.uniform(kw, (fan_in, fan_out), jnp.float32, -bound, bound)
        b = jax.random.uniform(kb, (1, fan_out), jnp.float32, -bound, bound)
        return w, b

    w1, b1 = lin_init(keys[0], keys[1], D, hidden_dim)
    w2, b2 = lin_init(keys[2], keys[3], hidden_dim, hidden_dim)
    w3, b3 = lin_init(keys[4], keys[5], hidden_dim, D)
    params = dict(w1=w1, b1=b1, w2=w2, b2=b2, w3=w3, b3=b3)

    # Observation times are multiples of delta_t (2 Euler steps per interval).
    times = jnp.arange(1, T + 1, dtype=jnp.float32) * 0.5
    Y = jax.random.normal(keys[6], (B, T, input_dim), jnp.float32)
    mask = (jax.random.uniform(keys[7], (B, T)) > 0.3).astype(jnp.float32)

    y_preds, y_traj, times_traj, h, h_cn, reverted_pred = node_ext_forward(
        times, Y, mask, params, Nc=Nc, input_dim=input_dim, delta_t=delta_t)

    jax.block_until_ready((y_preds, y_traj, times_traj, h, h_cn))
    assert y_preds.shape == (B, T, input_dim)
    assert y_traj.shape == (B, T, input_dim)
    assert h.shape == (B, D) and h_cn.shape == (B, D)
    assert reverted_pred is None
    print("KERNEL_OK")
</pallas_src>

<mosaic_0001>
module attributes {stable_mosaic.version = 11 : i64} {
  func.func @_node_ext_kernel(%arg0: i32, %arg1: memref<8xi32, #tpu.memory_space<smem>>, %arg2: memref<8x2x11xf32, #tpu.memory_space<vmem>>, %arg3: memref<8x2x1xf32, #tpu.memory_space<vmem>>, %arg4: memref<11x32xbf16, #tpu.memory_space<vmem>>, %arg5: memref<1x32xf32, #tpu.memory_space<vmem>>, %arg6: memref<32x32xbf16, #tpu.memory_space<vmem>>, %arg7: memref<1x32xf32, #tpu.memory_space<vmem>>, %arg8: memref<32x11xbf16, #tpu.memory_space<vmem>>, %arg9: memref<1x11xf32, #tpu.memory_space<vmem>>, %arg10: memref<8x2x11xf32, #tpu.memory_space<vmem>>, %arg11: memref<2x11xf32, #tpu.memory_space<vmem>>) attributes {dimension_semantics = [#tpu.dimension_semantics<arbitrary>], iteration_bounds = array<i64: 1>, scalar_prefetch = 1 : i64, scratch_operands = 0 : i64, tpu.core_type = #tpu.core_type<tc>, window_params = [{pipeline_mode = #tpu.pipeline_mode<synchronous>, transform_indices = @transform_0, window_bounds = array<i64: 8, 2, 11>}, {pipeline_mode = #tpu.pipeline_mode<synchronous>, transform_indices = @transform_1, window_bounds = array<i64: 8, 2, 1>}, {pipeline_mode = #tpu.pipeline_mode<synchronous>, transform_indices = @transform_2, window_bounds = array<i64: 11, 32>}, {pipeline_mode = #tpu.pipeline_mode<synchronous>, transform_indices = @transform_3, window_bounds = array<i64: 1, 32>}, {pipeline_mode = #tpu.pipeline_mode<synchronous>, transform_indices = @transform_4, window_bounds = array<i64: 32, 32>}, {pipeline_mode = #tpu.pipeline_mode<synchronous>, transform_indices = @transform_5, window_bounds = array<i64: 1, 32>}, {pipeline_mode = #tpu.pipeline_mode<synchronous>, transform_indices = @transform_6, window_bounds = array<i64: 32, 11>}, {pipeline_mode = #tpu.pipeline_mode<synchronous>, transform_indices = @transform_7, window_bounds = array<i64: 1, 11>}, {pipeline_mode = #tpu.pipeline_mode<synchronous>, transform_indices = @transform_8, window_bounds = array<i64: 8, 2, 11>}, {pipeline_mode = #tpu.pipeline_mode<synchronous>, transform_indices = @transform_9, window_bounds = array<i64: 2, 11>}]} {
    %c0 = arith.constant 0 : index
    %c0_0 = arith.constant 0 : index
    %0 = vector.load %arg4[%c0, %c0_0] : memref<11x32xbf16, #tpu.memory_space<vmem>>, vector<11x32xbf16>
    %c0_1 = arith.constant 0 : index
    %c0_2 = arith.constant 0 : index
    %1 = vector.load %arg5[%c0_1, %c0_2] : memref<1x32xf32, #tpu.memory_space<vmem>>, vector<1x32xf32>
    %c0_3 = arith.constant 0 : index
    %c0_4 = arith.constant 0 : index
    %2 = vector.load %arg6[%c0_3, %c0_4] : memref<32x32xbf16, #tpu.memory_space<vmem>>, vector<32x32xbf16>
    %c0_5 = arith.constant 0 : index
    %c0_6 = arith.constant 0 : index
    %3 = vector.load %arg7[%c0_5, %c0_6] : memref<1x32xf32, #tpu.memory_space<vmem>>, vector<1x32xf32>
    %c0_7 = arith.constant 0 : index
    %c0_8 = arith.constant 0 : index
    %4 = vector.load %arg8[%c0_7, %c0_8] : memref<32x11xbf16, #tpu.memory_space<vmem>>, vector<32x11xbf16>
    %c0_9 = arith.constant 0 : index
    %c0_10 = arith.constant 0 : index
    %5 = vector.load %arg9[%c0_9, %c0_10] : memref<1x11xf32, #tpu.memory_space<vmem>>, vector<1x11xf32>
    %6 = tpu.iota {dimensions = array<i32: 1>} : vector<2x11xi32>
    %c3_i32 = arith.constant 3 : i32
    %7 = vector.broadcast %c3_i32 : i32 to vector<2x11xi32>
    %8 = arith.cmpi slt, %6, %7 : vector<2x11xi32>
    %9 = arith.extui %8 : vector<2x11xi1> to vector<2x11xi32>
    %10 = arith.sitofp %9 : vector<2x11xi32> to vector<2x11xf32>
    %cst = arith.constant 0.000000e+00 : f32
    %11 = vector.broadcast %cst : f32 to vector<2x11xf32>
    %c0_i32 = arith.constant 0 : i32
    %c8_i32 = arith.constant 8 : i32
    %12 = arith.addi %c0_i32, %c8_i32 : i32
    %c1_i32 = arith.constant 1 : i32
    %13 = scf.for %arg12 = %c0_i32 to %12 step %c1_i32 iter_args(%arg13 = %11) -> (vector<2x11xf32>)  : i32 {
      %15 = arith.index_cast %arg12 : i32 to index
      %16 = memref.load %arg1[%15] : memref<8xi32, #tpu.memory_space<smem>>
      %c0_i32_14 = arith.constant 0 : i32
      %17 = arith.subi %16, %c0_i32_14 : i32
      %18 = arith.addi %c0_i32_14, %17 : i32
      %c1_i32_15 = arith.constant 1 : i32
      %19 = scf.for %arg14 = %c0_i32_14 to %18 step %c1_i32_15 iter_args(%arg15 = %arg13) -> (vector<2x11xf32>)  : i32 {
        %37 = arith.truncf %arg15 : vector<2x11xf32> to vector<2x11xbf16>
        %cst_23 = arith.constant dense<0.000000e+00> : vector<2x32xf32>
        %38 = tpu.matmul %37, %0, %cst_23 {dimension_numbers = #tpu.dot_dimension_numbers<[1], [0], [0], [1], [0, 0, 1, 1], [], []>} : vector<2x11xbf16>, vector<11x32xbf16>, vector<2x32xf32> -> vector<2x32xf32>
        %39 = vector.broadcast %1 : vector<1x32xf32> to vector<2x32xf32>
        %40 = arith.addf %38, %39 : vector<2x32xf32>
        %cst_24 = arith.constant 0.000000e+00 : f32
        %41 = vector.broadcast %cst_24 : f32 to vector<2x32xf32>
        %42 = arith.maximumf %40, %41 : vector<2x32xf32>
        %43 = arith.truncf %42 : vector<2x32xf32> to vector<2x32xbf16>
        %cst_25 = arith.constant dense<0.000000e+00> : vector<2x32xf32>
        %44 = tpu.matmul %43, %2, %cst_25 {dimension_numbers = #tpu.dot_dimension_numbers<[1], [0], [0], [1], [0, 0, 1, 1], [], []>} : vector<2x32xbf16>, vector<32x32xbf16>, vector<2x32xf32> -> vector<2x32xf32>
        %45 = vector.broadcast %3 : vector<1x32xf32> to vector<2x32xf32>
        %46 = arith.addf %44, %45 : vector<2x32xf32>
        %cst_26 = arith.constant 0.000000e+00 : f32
        %47 = vector.broadcast %cst_26 : f32 to vector<2x32xf32>
        %48 = arith.maximumf %46, %47 : vector<2x32xf32>
        %49 = arith.truncf %48 : vector<2x32xf32> to vector<2x32xbf16>
        %cst_27 = arith.constant dense<0.000000e+00> : vector<2x11xf32>
        %50 = tpu.matmul %49, %4, %cst_27 {dimension_numbers = #tpu.dot_dimension_numbers<[1], [0], [0], [1], [0, 0, 1, 1], [], []>} : vector<2x32xbf16>, vector<32x11xbf16>, vector<2x11xf32> -> vector<2x11xf32>
        %51 = arith.addf %arg15, %50 : vector<2x11xf32>
        %52 = vector.broadcast %5 : vector<1x11xf32> to vector<2x11xf32>
        %53 = arith.addf %51, %52 : vector<2x11xf32>
        scf.yield %53 : vector<2x11xf32>
      }
      %20 = arith.index_cast %arg12 : i32 to index
      %c0_16 = arith.constant 0 : index
      %c0_17 = arith.constant 0 : index
      %21 = vector.load %arg10[%20, %c0_16, %c0_17] : memref<8x2x11xf32, #tpu.memory_space<vmem>>, vector<1x2x11xf32>
      %22 = vector.shape_cast %21 : vector<1x2x11xf32> to vector<2x11xf32>
      %23 = vector.shape_cast %19 : vector<2x11xf32> to vector<1x2x11xf32>
      tpu.vector_store %arg10[%20, %c0_16, %c0_17], %23 {strides = array<i32>} : memref<8x2x11xf32, #tpu.memory_space<vmem>>, vector<1x2x11xf32>,
      %24 = arith.index_cast %arg12 : i32 to index
      %c0_18 = arith.constant 0 : index
      %c0_19 = arith.constant 0 : index
      %25 = vector.load %arg3[%24, %c0_18, %c0_19] : memref<8x2x1xf32, #tpu.memory_space<vmem>>, vector<1x2x1xf32>
      %26 = vector.shape_cast %25 : vector<1x2x1xf32> to vector<2x1xf32>
      %27 = vector.broadcast %26 : vector<2x1xf32> to vector<2x11xf32>
      %28 = arith.mulf %10, %27 : vector<2x11xf32>
      %29 = arith.index_cast %arg12 : i32 to index
      %c0_20 = arith.constant 0 : index
      %c0_21 = arith.constant 0 : index
      %30 = vector.load %arg2[%29, %c0_20, %c0_21] : memref<8x2x11xf32, #tpu.memory_space<vmem>>, vector<1x2x11xf32>
      %31 = vector.shape_cast %30 : vector<1x2x11xf32> to vector<2x11xf32>
      %32 = arith.mulf %31, %28 : vector<2x11xf32>
      %cst_22 = arith.constant 1.000000e+00 : f32
      %33 = vector.broadcast %cst_22 : f32 to vector<2x11xf32>
      %34 = arith.subf %33, %28 : vector<2x11xf32>
      %35 = arith.mulf %19, %34 : vector<2x11xf32>
      %36 = arith.addf %32, %35 : vector<2x11xf32>
      scf.yield %36 : vector<2x11xf32>
    }
    %c8_i32_11 = arith.constant 8 : i32
    %c0_12 = arith.constant 0 : index
    %c0_13 = arith.constant 0 : index
    %14 = vector.load %arg11[%c0_12, %c0_13] : memref<2x11xf32, #tpu.memory_space<vmem>>, vector<2x11xf32>
    tpu.vector_store %arg11[%c0_12, %c0_13], %13 {strides = array<i32>} : memref<2x11xf32, #tpu.memory_space<vmem>>, vector<2x11xf32>,
    return
  }
  func.func @transform_0(%arg0: i32, %arg1: memref<8xi32, #tpu.memory_space<smem>>) -> (i32, i32, i32) {
    %c0_i32 = arith.constant 0 : i32
    %c0_i32_0 = arith.constant 0 : i32
    %c0_i32_1 = arith.constant 0 : i32
    %c0_i32_2 = arith.constant 0 : i32
    return %c0_i32, %c0_i32_0, %c0_i32_1 : i32, i32, i32
  }
  func.func @transform_1(%arg0: i32, %arg1: memref<8xi32, #tpu.memory_space<smem>>) -> (i32, i32, i32) {
    %c0_i32 = arith.constant 0 : i32
    %c0_i32_0 = arith.constant 0 : i32
    %c0_i32_1 = arith.constant 0 : i32
    %c0_i32_2 = arith.constant 0 : i32
    return %c0_i32, %c0_i32_0, %c0_i32_1 : i32, i32, i32
  }
  func.func @transform_2(%arg0: i32, %arg1: memref<8xi32, #tpu.memory_space<smem>>) -> (i32, i32) {
    %c0_i32 = arith.constant 0 : i32
    %c0_i32_0 = arith.constant 0 : i32
    %c0_i32_1 = arith.constant 0 : i32
    return %c0_i32, %c0_i32_0 : i32, i32
  }
  func.func @transform_3(%arg0: i32, %arg1: memref<8xi32, #tpu.memory_space<smem>>) -> (i32, i32) {
    %c0_i32 = arith.constant 0 : i32
    %c0_i32_0 = arith.constant 0 : i32
    %c0_i32_1 = arith.constant 0 : i32
    return %c0_i32, %c0_i32_0 : i32, i32
  }
  func.func @transform_4(%arg0: i32, %arg1: memref<8xi32, #tpu.memory_space<smem>>) -> (i32, i32) {
    %c0_i32 = arith.constant 0 : i32
    %c0_i32_0 = arith.constant 0 : i32
    %c0_i32_1 = arith.constant 0 : i32
    return %c0_i32, %c0_i32_0 : i32, i32
  }
  func.func @transform_5(%arg0: i32, %arg1: memref<8xi32, #tpu.memory_space<smem>>) -> (i32, i32) {
    %c0_i32 = arith.constant 0 : i32
    %c0_i32_0 = arith.constant 0 : i32
    %c0_i32_1 = arith.constant 0 : i32
    return %c0_i32, %c0_i32_0 : i32, i32
  }
  func.func @transform_6(%arg0: i32, %arg1: memref<8xi32, #tpu.memory_space<smem>>) -> (i32, i32) {
    %c0_i32 = arith.constant 0 : i32
    %c0_i32_0 = arith.constant 0 : i32
    %c0_i32_1 = arith.constant 0 : i32
    return %c0_i32, %c0_i32_0 : i32, i32
  }
  func.func @transform_7(%arg0: i32, %arg1: memref<8xi32, #tpu.memory_space<smem>>) -> (i32, i32) {
    %c0_i32 = arith.constant 0 : i32
    %c0_i32_0 = arith.constant 0 : i32
    %c0_i32_1 = arith.constant 0 : i32
    return %c0_i32, %c0_i32_0 : i32, i32
  }
  func.func @transform_8(%arg0: i32, %arg1: memref<8xi32, #tpu.memory_space<smem>>) -> (i32, i32, i32) {
    %c0_i32 = arith.constant 0 : i32
    %c0_i32_0 = arith.constant 0 : i32
    %c0_i32_1 = arith.constant 0 : i32
    %c0_i32_2 = arith.constant 0 : i32
    return %c0_i32, %c0_i32_0, %c0_i32_1 : i32, i32, i32
  }
  func.func @transform_9(%arg0: i32, %arg1: memref<8xi32, #tpu.memory_space<smem>>) -> (i32, i32) {
    %c0_i32 = arith.constant 0 : i32
    %c0_i32_0 = arith.constant 0 : i32
    %c0_i32_1 = arith.constant 0 : i32
    return %c0_i32, %c0_i32_0 : i32, i32
  }
}

</mosaic_0001>

<bundles_post_ra>
// kernel: tpu_custom_call.1
= control target key start
LH: loop header
LB: loop body
LE: loop exit
PB: predicated region body
PF: predicated region fallthrough
CT: control target
= control target key end

     0   :  { %s486_s16 = smov [#allocation3]   ;;  %s674_s0 = inlined_call_operand.vmem [shape: s32[8], index: 0, kind: input, shape index: {}]   ;;  %s675_s1 = inlined_call_operand.vmem [shape: f32[8,2,11], index: 1, kind: input, shape index: {}]   ;;  %s676_s2 = inlined_call_operand.vmem [shape: f32[8,2,1], index: 2, kind: input, shape index: {}]   ;;  %s677_s3 = inlined_call_operand.hbm [shape: bf16[11,32], index: 3, kind: input, shape index: {}]   ;;  %s678_s4 = inlined_call_operand.vmem [shape: f32[1,32], index: 4, kind: input, shape index: {}]   ;;  %s679_s5 = inlined_call_operand.vmem [shape: bf16[32,32], index: 5, kind: input, shape index: {}]   ;;  %s680_s6 = inlined_call_operand.vmem [shape: f32[1,32], index: 6, kind: input, shape index: {}]   ;;  %s681_s7 = inlined_call_operand.vmem [shape: bf16[32,11], index: 7, kind: input, shape index: {}]   ;;  %s682_s8 = inlined_call_operand.vmem [shape: f32[1,11], index: 8, kind: input, shape index: {}]   ;;  %s683_s9 = inlined_call_operand.hbm [shape: f32[8,2,11], index: 9, kind: output, shape index: {0}]   ;;  %s684_s10 = inlined_call_operand.hbm [shape: f32[2,11], index: 10, kind: output, shape index: {1}]  }
   0x1   :  { %s17_s15 = sshll.u32 %s674_s0, 4  ;;  %s18_s15 = int_to_ptr.vmem [resolvable:$true] %s17_s15 }
   0x2   :  { %20 = dma.vmem_to_smem %s18_s15, 16, %s486_s16, [#allocation2] }
   0x3   :  { %458 = dma.done.wait [#allocation2], 16 }
   0x4   :  { %459 = vsyncadd [#allocation2], 4294967280 }
   0x5   :  { %23 = sfence }
   0x6   :  { %24 = vsyncpa [#allocation5], 0 }
   0x7   :  { %25 = vsyncpa [#allocation6], 0 }
   0x8   :  { %26 = vsyncpa [#allocation9], 0  ;;  %s35_s19 = sshll.u32 %s677_s3, 4  ;;  %s487_s20 = smov [#allocation4]   ;;  %s36_s19 = int_to_ptr.hbm [resolvable:$true] %s35_s19 }
   0x9   :  { %s37_s21 = sshll.u32 %s487_s20, 4  ;;  %s488_s22 = smov 64   ;;  %s38_s21 = int_to_ptr.vmem [resolvable:$true] %s37_s21 }
   0xa   :  { %s489_s23 = smov 4  }
   0xb   :  { %43 = dma.hbm_to_vmem [thread:$0]  %s36_s19, 128, %s38_s21, [#allocation5], %s488_s22, %s488_s22, %s489_s23  }
   0xc   :  { %460 = dma.done.wait [#allocation5], 128  }
   0xd   :  { %461 = vsyncadd [#allocation5], 4294967168  ;;  %v72_v0 = vlaneseq  ;;  %v490_v2 = vmov 0.0   ;;  %v560_v4 = vld [vmem:[#allocation4] sm:$0xf]  ;;  %v619_v17 = vmov 0.0  }
   0xe   :  { %v562_v5 = vld [vmem:[#allocation4] sm:$0x30]  ;;  %v567_v6 = vld [vmem:[%s678_s4] sm:$0x1]  ;;  %v582_v9 = vld [vmem:[%s679_s5 + $0x8] sm:$0xf] }
   0xf   :  { %v73_v1 = vand.u32 127, %v72_v0  ;;  %v572_v7 = vld [vmem:[%s679_s5] sm:$0xf]  ;;  %v577_v8 = vld [vmem:[%s679_s5] sm:$0xf0]  ;;  %s621_s21 = smov 0  }
  0x10   :  { %v587_v10 = vld [vmem:[%s679_s5 + $0x8] sm:$0xf0]  ;;  %v592_v11 = vld [vmem:[%s680_s6] sm:$0x1]  ;;  %v602_v13 = vld [vmem:[%s681_s7] sm:$0xf0] }
  0x11   :  { %vm74_vm0 = vcmp.lt.s32.totalorder %v73_v1, 3  ;;  %v597_v12 = vld [vmem:[%s681_s7] sm:$0xf]  ;;  %v607_v14 = vld [vmem:[%s681_s7 + $0x8] sm:$0xf] }
  0x12   :  { %v558_v3 = vsel %vm74_vm0, 1.0, %v490_v2  ;;  %v612_v15 = vld [vmem:[%s681_s7 + $0x8] sm:$0xf0]  ;;  %v617_v16 = vld [vmem:[%s682_s8] sm:$0x1] }
  0x13 LB: > { %s628_s22 = sld [smem:[#allocation3 + %s472_s21]]  ;;  %v482_v18 = vmov %v468_v17   ;;  %s472_s21 = sphi %s621_s21, %s82_s21   ;;  %v468_v17 = vphi %v619_v17, %v685_v17  }
  0x19   : > { %p272_p0 = scmp.le.s32.totalorder %s628_s22, 0 }
  0x1a   : > { %s631_s7 = smov (!%p272_p0), 0  }
  0x1b   : > { %258 = sbr.rel (%p272_p0) target bundleno = 445 (0x1bd), region = 75 }
  0x20   : > { %v474_v19 = vmov %v468_v17  }
  0x21 LB: >> { %v276_v20 = vor.u32 %v562_v5, %v560_v4  ;;  %vm105_vm1 = vcmask 1044480   ;;  %vm106_vm2 = vcmask 1045504   ;;  %v491_v21 = vmov 65535   ;;  %s88_s7 = sadd.s32 1, %s480_s7   ;;  %s480_s7 = sphi %s631_s7, %s88_s7   ;;  %v476_v19 = vphi %v474_v19, %v475_v19  }
  0x22   : >> { %v107_v22 = vsel %vm105_vm1, 4294967295, %v491_v21  ;;  %v92_v25 = vpack.c.bf16 %v476_v19, %v476_v19  ;;  %vm101_vm3 = vcmask 89088   ;;  %v285_v26 = vor.u32 %v587_v10, %v582_v9  ;;  %p87_p1 = scmp.ge.s32.totalorder %s88_s7, %s628_s22 }
  0x23   : >> { %v108_v23 = vsel %vm106_vm2, %v107_v22, 0  ;;  %v281_v27 = vor.u32 %v577_v8, %v572_v7  ;;  %v94_v28 = vperm.slane %v567_v6, 0  ;;  %vm142_vm4 = vcmask 261120  }
  0x24   : >> { %v110_v24 = vand.u32 %v276_v20, %v108_v23  ;;  %152 = vmatpush.bf16.msra.mxu1 %v285_v26  ;;  %v294_v34 = vor.u32 %v612_v15, %v607_v14  ;;  %v290_v35 = vor.u32 %v602_v13, %v597_v12  ;;  %v128_v36 = vperm.slane %v592_v11, 0 }
  0x25   : >> { %v191_v42 = vperm.slane %v617_v16, 0 }
  0x26   : >> { %119 = vmatpush.bf16.msra.mxu0 %v110_v24  ;;  %182 = vmatpush.bf16.msra.mxu2 %v294_v34 }
  0x28   : >> { %153 = vmatpush.bf16.msra.mxu1 %v281_v27 }
  0x29   : >> { %277 = vmatmul.msk.bf16.vlgmr.msra.gmra.mxu0 %vm101_vm3, %v92_v25 }
  0x2a   : >> { %183 = vmatpush.bf16.msra.mxu2 %v290_v35 }
  0xa6   : >> { %v121_v29 = vpop.f32.mrf.mxu0 }
  0xa7   : >> { %v122_v30 = vadd.f32 %v121_v29, %v94_v28 }
  0xa9   : >> { %v125_v31 = vmax.f32 %v122_v30, 0.0 }
  0xab   : >> { %v126_v32 = vpack.c.bf16 %v125_v31, %v125_v31 }
  0xad   : >> { %286 = vmatmul.msk.bf16.vlgmr.msra.gmra.mxu1 %vm142_vm4, %v126_v32 }
  0xae   : >> { %v123_v33 = vpop.f32.mrf.mxu0 }
 0x12a   : >> { %v155_v37 = vpop.f32.mrf.mxu1 }
 0x12b   : >> { %v156_v38 = vadd.f32 %v155_v37, %v128_v36 }
 0x12d   : >> { %v159_v39 = vmax.f32 %v156_v38, 0.0 }
 0x12f   : >> { %v160_v40 = vpack.c.bf16 %v159_v39, %v159_v39 }
 0x131   : >> { %295 = vmatmul.msk.bf16.vlgmr.msra.gmra.mxu2 %vm142_vm4, %v160_v40 }
 0x132   : >> { %v157_v41 = vpop.f32.mrf.mxu1 }
 0x1b4   : >> { %v185_v43 = vpop.f32.mrf.mxu2 }
 0x1b5   : >> { %v189_v44 = vadd.f32 %v476_v19, %v185_v43 }
 0x1b7   : >> { %v193_v45 = vadd.f32 %v191_v42, %v189_v44  }
 0x1b8   : > { %90 = sbr.rel (!%p87_p1) target bundleno = 33 (0x21), region = 81 }
 0x1b9   : >> { %v475_v19 = vmov %v193_v45   ;;  %v483_v18 = vmov (%p87_p1), %v193_v45  }
 0x1bc   : >> { %v187_v46 = vpop.f32.mrf.mxu2 }
 0x1bd PF: > { %s296_s8 = sshll.u32 %s472_s21, 1  ;;  %vm196_vm5 = vcmask 82944   ;;  %v492_v47 = vmov 0   ;;  %s82_s21 = sadd.s32 1, %s472_s21   ;;  %v484_v18 = vphi %v482_v18, %v483_v18  }
 0x1be   : > { %353 = vset.pattern.permute.xlu0 %v492_v47  ;;  %s198_s3 = scalar_lea.vmem %s676_s2, %s296_s8  ;;  %s195_s24 = scalar_lea.vmem [#allocation7], %s296_s8 }
 0x1bf   : > { %v199_v48 = vld [vmem:[%s198_s3] sm:$0x3]  ;;  %197 = vst.msk [vmem:[%s195_s24] sm:$0x3] %vm196_vm5, %v484_v18  ;;  %s206_s27 = scalar_lea.vmem %s675_s1, %s296_s8  ;;  %p79_p2 = scmp.ge.s32.totalorder %s82_s21, 8  }
 0x1c0   : > { %202 = vperm.xlu0 %353, %v199_v48   ;;  %v207_v51 = vld [vmem:[%s206_s27] sm:$0x3]  ;;  %s220_s30 = sshll.u32 (%p79_p2), %s683_s9, 4  ;;  %s493_s11 = smov (%p79_p2), [#allocation7]   ;;  %s221_s30 = int_to_ptr.hbm [resolvable:$true] %s220_s30 }
 0x1c1   :  { %s218_s4 = sshll.u32 (%p79_p2), %s493_s11, 4  ;;  %s494_s12 = smov (%p79_p2), 32   ;;  %s219_s4 = int_to_ptr.vmem [resolvable:$true] %s218_s4 }
 0x1c2   :  { %s495_s13 = smov (%p79_p2), 2   ;;  %s496_s14 = smov (%p79_p2), [#allocation8]  }
 0x1c3   :  { %226 = dma.vmem_to_hbm [thread:$0]  (%p79_p2), %s219_s4, 256, %s221_s30, [#allocation6], %s494_s12, %s494_s12, %s495_s13  }
 0x1c4   :  { %s232_s15 = sshll.u32 (%p79_p2), %s496_s14, 4  ;;  %s234_s18 = sshll.u32 (%p79_p2), %s684_s10, 4  ;;  %s233_s15 = int_to_ptr.vmem [resolvable:$true] %s232_s15  ;;  %s235_s18 = int_to_ptr.hbm [resolvable:$true] %s234_s18 }
 0x232   : > { %v203_v49 = vpop.permute.xlu0 %202 }
 0x233   : > { %v205_v50 = vmul.f32 %v558_v3, %v203_v49 }
 0x235   : > { %v209_v52 = vsub.f32 1.0, %v205_v50  ;;  %v208_v53 = vmul.f32 %v207_v51, %v205_v50 }
 0x237   : > { %v210_v54 = vmul.f32 %v484_v18, %v209_v52  ;;  %81 = sbr.rel (!%p79_p2) target bundleno = 19 (0x13), region = 92 }
 0x239   : > { %v211_v55 = vadd.f32 %v210_v54, %v208_v53  }
 0x23b   : > { %v685_v17 = vmov %v211_v55  ;;  %213 = vst.msk [vmem:[#allocation8] sm:$0x3] (%p79_p2), %vm196_vm5, %v211_v55 }
 0x23c   :  { %237 = dma.vmem_to_hbm [thread:$0]  %s233_s15, 32, %s235_s18, [#allocation9]  }
 0x23d   :  { %462 = dma.done.wait [#allocation6], 256  }
 0x23e   :  { %463 = vsyncadd [#allocation6], 4294967040 }
 0x23f   :  { %464 = dma.done.wait [#allocation9], 32  }
 0x240   :  { %465 = vsyncadd [#allocation9], 4294967264 }
 0x241   :  { %246 = vsyncpa [#allocation5], 1 }
 0x242   :  { %247 = vsyncpa [#allocation6], 1 }
 0x243   :  { %248 = vsyncpa [#allocation9], 1 }

</bundles_post_ra>
